<compile_context>
chip_gen: v6e
topology: v6e:2x2x1
jax: 0.10.0
libtpu: 0.0.40
codegen_flags: <defaults>
</compile_context>

<pallas_src>
import math
import functools

import jax
import jax.numpy as jnp
from jax import lax
from jax.experimental import pallas as pl
from jax.experimental.pallas import tpu as pltpu


def _round_up(x, m):
    return ((x + m - 1) // m) * m


# ---------------------------------------------------------------------------
# Tiled linear (matmul + bias) kernel:  y = x @ w + b
# ---------------------------------------------------------------------------
def _linear_kernel(x_ref, w_ref, b_ref, o_ref, acc_ref):
    @pl.when(pl.program_id(2) == 0)
    def _():
        acc_ref[...] = jnp.zeros_like(acc_ref)

    acc_ref[...] += jnp.dot(x_ref[...], w_ref[...],
                            preferred_element_type=jnp.float32)

    @pl.when(pl.program_id(2) == pl.num_programs(2) - 1)
    def _():
        # Bias added once, in the finalize step only.
        o_ref[...] = (acc_ref[...] + b_ref[...]).astype(o_ref.dtype)


def linear(x2d, w, b):
    """x2d: [M, K], w: [K, N], b: [N] -> [M, N] (f32 accumulation)."""
    M, K = x2d.shape
    N = w.shape[1]

    # Adaptive tiles: sublane dim (M) multiple of 8, lane dims (K, N) 128-dense.
    tm = min(128, _round_up(M, 8))
    tk = min(512, _round_up(K, 128))
    tn = min(128, _round_up(N, 128))

    Mp, Kp, Np = _round_up(M, tm), _round_up(K, tk), _round_up(N, tn)

    xp = x2d if (Mp == M and Kp == K) else jnp.pad(x2d, ((0, Mp - M), (0, Kp - K)))
    wp = w if (Kp == K and Np == N) else jnp.pad(w, ((0, Kp - K), (0, Np - N)))
    bp = (b if Np == N else jnp.pad(b, (0, Np - N))).reshape(1, Np)

    grid = (Mp // tm, Np // tn, Kp // tk)
    out = pl.pallas_call(
        _linear_kernel,
        out_shape=jax.ShapeDtypeStruct((Mp, Np), x2d.dtype),
        grid_spec=pltpu.PrefetchScalarGridSpec(
            num_scalar_prefetch=0,
            grid=grid,
            in_specs=[
                pl.BlockSpec((tm, tk), lambda i, j, k: (i, k)),
                pl.BlockSpec((tk, tn), lambda i, j, k: (k, j)),
                pl.BlockSpec((1, tn), lambda i, j, k: (0, j)),
            ],
            out_specs=pl.BlockSpec((tm, tn), lambda i, j, k: (i, j)),
            scratch_shapes=[pltpu.VMEM((tm, tn), jnp.float32)],
        ),
        compiler_params=pltpu.CompilerParams(
            dimension_semantics=("parallel", "parallel", "arbitrary")),
        cost_estimate=pl.CostEstimate(
            flops=2 * Mp * Np * Kp,
            transcendentals=0,
            bytes_accessed=4 * (Mp * Kp + Kp * Np + Mp * Np)),
    )(xp, wp, bp)
    if Mp == M and Np == N:
        return out
    return out[:M, :N]


# ---------------------------------------------------------------------------
# Flash-style non-causal attention kernel over [B*heads, T, head_size]
# ---------------------------------------------------------------------------
def attention(q, k, v):
    """q, k, v: [BH, T, hs] -> [BH, T, hs], softmax(q k^T / sqrt(hs)) v."""
    BH, T, hs = q.shape
    scale = 1.0 / math.sqrt(hs)

    # Adaptive sequence tiles (multiple of 8, capped at 128); lane-dense head dim.
    tq = min(128, _round_up(T, 8))
    tk = min(128, _round_up(T, 8))
    Tp = _round_up(T, max(tq, tk))
    Hp = _round_up(hs, 128)
    needs_kv_mask = (Tp != T)        # compile-time: mask only if keys are padded

    def pad3(z):
        if Tp == T and Hp == hs:
            return z
        return jnp.pad(z, ((0, 0), (0, Tp - T), (0, Hp - hs)))

    qp, kp, vp = pad3(q), pad3(k), pad3(v)

    def kernel(q_ref, k_ref, v_ref, o_ref, m_sc, l_sc, acc_sc):
        kv = pl.program_id(2)

        @pl.when(kv == 0)
        def _():
            m_sc[...] = jnp.full_like(m_sc, -1e30)
            l_sc[...] = jnp.zeros_like(l_sc)
            acc_sc[...] = jnp.zeros_like(acc_sc)

        qb = q_ref[0]                              # (tq, Hp)
        kb = k_ref[0]                              # (tk, Hp)
        # s = q @ k^T  (contract head dim), MXU, f32 accumulation
        s = lax.dot_general(qb, kb, (((1,), (1,)), ((), ())),
                            preferred_element_type=jnp.float32) * scale

        if needs_kv_mask:
            # Padded key positions (zero-padded rows) must not receive weight.
            col = kv * tk + lax.broadcasted_iota(jnp.int32, s.shape, 1)
            s = jnp.where(col < T, s, -1e30)

        m_prev = m_sc[...]
        m_new = jnp.maximum(m_prev, s.max(axis=-1, keepdims=True))
        alpha = jnp.exp(m_prev - m_new)
        p = jnp.exp(s - m_new)
        l_sc[...] = alpha * l_sc[...] + p.sum(axis=-1, keepdims=True)
        acc_sc[...] = alpha * acc_sc[...] + jnp.dot(
            p.astype(v_ref.dtype), v_ref[0], preferred_element_type=jnp.float32)
        m_sc[...] = m_new

        @pl.when(kv == pl.num_programs(2) - 1)
        def _():
            o_ref[0] = (acc_sc[...] / l_sc[...]).astype(o_ref.dtype)

    grid = (BH, Tp // tq, Tp // tk)
    out = pl.pallas_call(
        kernel,
        out_shape=jax.ShapeDtypeStruct((BH, Tp, Hp), q.dtype),
        grid_spec=pltpu.PrefetchScalarGridSpec(
            num_scalar_prefetch=0,
            grid=grid,
            in_specs=[
                pl.BlockSpec((1, tq, Hp), lambda b, qi, ki: (b, qi, 0)),
                pl.BlockSpec((1, tk, Hp), lambda b, qi, ki: (b, ki, 0)),
                pl.BlockSpec((1, tk, Hp), lambda b, qi, ki: (b, ki, 0)),
            ],
            out_specs=pl.BlockSpec((1, tq, Hp), lambda b, qi, ki: (b, qi, 0)),
            scratch_shapes=[
                pltpu.VMEM((tq, 1), jnp.float32),    # running max m
                pltpu.VMEM((tq, 1), jnp.float32),    # running denom l
                pltpu.VMEM((tq, Hp), jnp.float32),   # running numerator
            ],
        ),
        compiler_params=pltpu.CompilerParams(
            dimension_semantics=("parallel", "parallel", "arbitrary")),
        cost_estimate=pl.CostEstimate(
            flops=4 * BH * Tp * Tp * Hp,
            transcendentals=BH * Tp * Tp,
            bytes_accessed=4 * BH * (3 * Tp * Hp + Tp * Hp)),
    )(qp, kp, vp)
    if Tp == T and Hp == hs:
        return out
    return out[:, :T, :hs]


# ---------------------------------------------------------------------------
# Full module forward
# ---------------------------------------------------------------------------
@functools.partial(jax.jit, static_argnames=("n_heads",))
def acausal_self_attention(x, wqkv, bqkv, wproj, bproj, n_heads):
    """x: [B, T, C]; PyTorch Linear layout: wqkv [3C, C], wproj [C, C]."""
    B, T, C = x.shape
    hs = C // n_heads

    # Fused QKV projection (Pallas tiled matmul). PyTorch Linear: x @ W^T + b.
    qkv = linear(x.reshape(B * T, C), wqkv.T, bqkv)           # [B*T, 3C]
    qkv = qkv.reshape(B, T, 3 * C)
    q, k, v = jnp.split(qkv, 3, axis=-1)

    def to_heads(z):
        return (z.reshape(B, T, n_heads, hs)
                 .transpose(0, 2, 1, 3)
                 .reshape(B * n_heads, T, hs))

    q, k, v = map(to_heads, (q, k, v))

    # TODO(synk): attn_dropout is identity here (inference / p = 0.0).
    o = attention(q, k, v)                                    # [B*nh, T, hs]

    o = (o.reshape(B, n_heads, T, hs)
          .transpose(0, 2, 1, 3)
          .reshape(B * T, C))

    # Output projection.
    out = linear(o, wproj.T, bproj)                           # [B*T, C]
    # TODO(synk): resid_dropout is identity here (inference / p = 0.0).
    return out.reshape(B, T, C)


def _reference(x, wqkv, bqkv, wproj, bproj, n_heads):
    B, T, C = x.shape
    hs = C // n_heads
    qkv = x @ wqkv.T + bqkv
    q, k, v = jnp.split(qkv, 3, axis=-1)

    def heads(z):
        return z.reshape(B, T, n_heads, hs).transpose(0, 2, 1, 3)

    q, k, v = map(heads, (q, k, v))
    w = (q @ jnp.swapaxes(k, -2, -1)) * (1.0 / math.sqrt(hs))
    w = jax.nn.softmax(w, axis=-1)
    o = w @ v
    o = o.transpose(0, 2, 1, 3).reshape(B, T, C)
    return o @ wproj.T + bproj


if __name__ == "__main__":
    # Keep both the kernel's in-kernel matmuls and the reference at full f32.
    jax.config.update("jax_default_matmul_precision", "highest")

    # Small shapes consistent with the module: B=2, T=8, n_embed=32, heads=4.
    B, T, C, n_heads = 2, 8, 32, 4

    key = jax.random.PRNGKey(0)
    kx, k1, k2, k3, k4 = jax.random.split(key, 5)
    x = jax.random.normal(kx, (B, T, C), dtype=jnp.float32)
    # PyTorch nn.Linear layout: weight [out_features, in_features], bias [out].
    wqkv = jax.random.normal(k1, (3 * C, C), dtype=jnp.float32) * 0.05
    bqkv = jax.random.normal(k2, (3 * C,), dtype=jnp.float32) * 0.05
    wproj = jax.random.normal(k3, (C, C), dtype=jnp.float32) * 0.05
    bproj = jax.random.normal(k4, (C,), dtype=jnp.float32) * 0.05

    out = acausal_self_attention(x, wqkv, bqkv, wproj, bproj, n_heads)
    out = jax.block_until_ready(out)

    ref = _reference(x, wqkv, bqkv, wproj, bproj, n_heads)
    assert out.shape == (B, T, C), out.shape
    err = float(jnp.max(jnp.abs(out - ref)))
    assert jnp.allclose(out, ref, atol=1e-4, rtol=1e-4), f"mismatch, max abs err={err}"

    print("KERNEL_OK")
</pallas_src>

<mosaic_0001>
module attributes {stable_mosaic.version = 11 : i64} {
  func.func @_linear_kernel(%arg0: i32, %arg1: i32, %arg2: i32, %arg3: memref<16x128xf32, #tpu.memory_space<vmem>>, %arg4: memref<128x128xf32, #tpu.memory_space<vmem>>, %arg5: memref<1x128xf32, #tpu.memory_space<vmem>>, %arg6: memref<16x128xf32, #tpu.memory_space<vmem>>, %arg7: memref<16x128xf32, #tpu.memory_space<vmem>>) attributes {dimension_semantics = [#tpu.dimension_semantics<parallel>, #tpu.dimension_semantics<parallel>, #tpu.dimension_semantics<arbitrary>], iteration_bounds = array<i64: 1, 1, 1>, scalar_prefetch = 0 : i64, scratch_operands = 1 : i64, tpu.core_type = #tpu.core_type<tc>, window_params = [{transform_indices = @transform_0, window_bounds = array<i64: 16, 128>}, {transform_indices = @transform_1, window_bounds = array<i64: 128, 128>}, {transform_indices = @transform_2, window_bounds = array<i64: 1, 128>}, {transform_indices = @transform_3, window_bounds = array<i64: 16, 128>}]} {
    %c0_i32 = arith.constant 0 : i32
    %0 = arith.cmpi eq, %arg2, %c0_i32 : i32
    %1 = arith.extui %0 : i1 to i32
    %c0_i32_0 = arith.constant 0 : i32
    %2 = arith.cmpi ne, %1, %c0_i32_0 : i32
    scf.if %2 {
      %cst_10 = arith.constant 0.000000e+00 : f32
      %12 = vector.broadcast %cst_10 : f32 to vector<16x128xf32>
      %c0_11 = arith.constant 0 : index
      %c0_12 = arith.constant 0 : index
      %13 = vector.load %arg7[%c0_11, %c0_12] : memref<16x128xf32, #tpu.memory_space<vmem>>, vector<16x128xf32>
      tpu.vector_store %arg7[%c0_11, %c0_12], %12 {strides = array<i32>} : memref<16x128xf32, #tpu.memory_space<vmem>>, vector<16x128xf32>,
    } else {
    }
    %c0 = arith.constant 0 : index
    %c0_1 = arith.constant 0 : index
    %3 = vector.load %arg7[%c0, %c0_1] : memref<16x128xf32, #tpu.memory_space<vmem>>, vector<16x128xf32>
    %c0_2 = arith.constant 0 : index
    %c0_3 = arith.constant 0 : index
    %4 = vector.load %arg3[%c0_2, %c0_3] : memref<16x128xf32, #tpu.memory_space<vmem>>, vector<16x128xf32>
    %c0_4 = arith.constant 0 : index
    %c0_5 = arith.constant 0 : index
    %5 = vector.load %arg4[%c0_4, %c0_5] : memref<128x128xf32, #tpu.memory_space<vmem>>, vector<128x128xf32>
    %cst = arith.constant dense<0.000000e+00> : vector<16x128xf32>
    %6 = tpu.matmul %4, %5, %cst {dimension_numbers = #tpu.dot_dimension_numbers<[1], [0], [0], [1], [0, 0, 1, 1], [], []>, precision = #tpu.contract_precision<fp32>} : vector<16x128xf32>, vector<128x128xf32>, vector<16x128xf32> -> vector<16x128xf32>
    %7 = arith.addf %3, %6 : vector<16x128xf32>
    %c0_6 = arith.constant 0 : index
    %c0_7 = arith.constant 0 : index
    %8 = vector.load %arg7[%c0_6, %c0_7] : memref<16x128xf32, #tpu.memory_space<vmem>>, vector<16x128xf32>
    tpu.vector_store %arg7[%c0_6, %c0_7], %7 {strides = array<i32>} : memref<16x128xf32, #tpu.memory_space<vmem>>, vector<16x128xf32>,
    %c0_i32_8 = arith.constant 0 : i32
    %9 = arith.cmpi eq, %arg2, %c0_i32_8 : i32
    %10 = arith.extui %9 : i1 to i32
    %c0_i32_9 = arith.constant 0 : i32
    %11 = arith.cmpi ne, %10, %c0_i32_9 : i32
    scf.if %11 {
      %c0_10 = arith.constant 0 : index
      %c0_11 = arith.constant 0 : index
      %12 = vector.load %arg7[%c0_10, %c0_11] : memref<16x128xf32, #tpu.memory_space<vmem>>, vector<16x128xf32>
      %c0_12 = arith.constant 0 : index
      %c0_13 = arith.constant 0 : index
      %13 = vector.load %arg5[%c0_12, %c0_13] : memref<1x128xf32, #tpu.memory_space<vmem>>, vector<1x128xf32>
      %14 = vector.broadcast %13 : vector<1x128xf32> to vector<16x128xf32>
      %15 = arith.addf %12, %14 : vector<16x128xf32>
      %c0_14 = arith.constant 0 : index
      %c0_15 = arith.constant 0 : index
      %16 = vector.load %arg6[%c0_14, %c0_15] : memref<16x128xf32, #tpu.memory_space<vmem>>, vector<16x128xf32>
      tpu.vector_store %arg6[%c0_14, %c0_15], %15 {strides = array<i32>} : memref<16x128xf32, #tpu.memory_space<vmem>>, vector<16x128xf32>,
    } else {
    }
    return
  }
  func.func @transform_0(%arg0: i32, %arg1: i32, %arg2: i32) -> (i32, i32) {
    %c0_i32 = arith.constant 0 : i32
    return %arg0, %arg2 : i32, i32
  }
  func.func @transform_1(%arg0: i32, %arg1: i32, %arg2: i32) -> (i32, i32) {
    %c0_i32 = arith.constant 0 : i32
    return %arg2, %arg1 : i32, i32
  }
  func.func @transform_2(%arg0: i32, %arg1: i32, %arg2: i32) -> (i32, i32) {
    %c0_i32 = arith.constant 0 : i32
    %c0_i32_0 = arith.constant 0 : i32
    return %c0_i32, %arg1 : i32, i32
  }
  func.func @transform_3(%arg0: i32, %arg1: i32, %arg2: i32) -> (i32, i32) {
    %c0_i32 = arith.constant 0 : i32
    return %arg0, %arg1 : i32, i32
  }
}

module attributes {stable_mosaic.version = 11 : i64} {
  func.func @kernel(%arg0: i32, %arg1: i32, %arg2: i32, %arg3: memref<1x8x128xf32, #tpu.memory_space<vmem>>, %arg4: memref<1x8x128xf32, #tpu.memory_space<vmem>>, %arg5: memref<1x8x128xf32, #tpu.memory_space<vmem>>, %arg6: memref<1x8x128xf32, #tpu.memory_space<vmem>>, %arg7: memref<8x1xf32, #tpu.memory_space<vmem>>, %arg8: memref<8x1xf32, #tpu.memory_space<vmem>>, %arg9: memref<8x128xf32, #tpu.memory_space<vmem>>) attributes {dimension_semantics = [#tpu.dimension_semantics<parallel>, #tpu.dimension_semantics<parallel>, #tpu.dimension_semantics<arbitrary>], iteration_bounds = array<i64: 8, 1, 1>, scalar_prefetch = 0 : i64, scratch_operands = 3 : i64, tpu.core_type = #tpu.core_type<tc>, window_params = [{transform_indices = @transform_0, window_bounds = array<i64: 1, 8, 128>}, {transform_indices = @transform_1, window_bounds = array<i64: 1, 8, 128>}, {transform_indices = @transform_2, window_bounds = array<i64: 1, 8, 128>}, {transform_indices = @transform_3, window_bounds = array<i64: 1, 8, 128>}]} {
    %c0_i32 = arith.constant 0 : i32
    %0 = arith.cmpi eq, %arg2, %c0_i32 : i32
    %1 = arith.extui %0 : i1 to i32
    %c0_i32_0 = arith.constant 0 : i32
    %2 = arith.cmpi ne, %1, %c0_i32_0 : i32
    scf.if %2 {
      %cst_27 = arith.constant -1.000000e+30 : f32
      %37 = vector.broadcast %cst_27 : f32 to vector<8x1xf32>
      %c0_28 = arith.constant 0 : index
      %c0_29 = arith.constant 0 : index
      %38 = vector.load %arg7[%c0_28, %c0_29] : memref<8x1xf32, #tpu.memory_space<vmem>>, vector<8x1xf32>
      tpu.vector_store %arg7[%c0_28, %c0_29], %37 {strides = array<i32>} : memref<8x1xf32, #tpu.memory_space<vmem>>, vector<8x1xf32>,
      %cst_30 = arith.constant 0.000000e+00 : f32
      %39 = vector.broadcast %cst_30 : f32 to vector<8x1xf32>
      %c0_31 = arith.constant 0 : index
      %c0_32 = arith.constant 0 : index
      %40 = vector.load %arg8[%c0_31, %c0_32] : memref<8x1xf32, #tpu.memory_space<vmem>>, vector<8x1xf32>
      tpu.vector_store %arg8[%c0_31, %c0_32], %39 {strides = array<i32>} : memref<8x1xf32, #tpu.memory_space<vmem>>, vector<8x1xf32>,
      %cst_33 = arith.constant 0.000000e+00 : f32
      %41 = vector.broadcast %cst_33 : f32 to vector<8x128xf32>
      %c0_34 = arith.constant 0 : index
      %c0_35 = arith.constant 0 : index
      %42 = vector.load %arg9[%c0_34, %c0_35] : memref<8x128xf32, #tpu.memory_space<vmem>>, vector<8x128xf32>
      tpu.vector_store %arg9[%c0_34, %c0_35], %41 {strides = array<i32>} : memref<8x128xf32, #tpu.memory_space<vmem>>, vector<8x128xf32>,
    } else {
    }
    %c0 = arith.constant 0 : index
    %c0_1 = arith.constant 0 : index
    %c0_2 = arith.constant 0 : index
    %3 = vector.load %arg3[%c0, %c0_1, %c0_2] : memref<1x8x128xf32, #tpu.memory_space<vmem>>, vector<1x8x128xf32>
    %4 = vector.shape_cast %3 : vector<1x8x128xf32> to vector<8x128xf32>
    %c0_3 = arith.constant 0 : index
    %c0_4 = arith.constant 0 : index
    %c0_5 = arith.constant 0 : index
    %5 = vector.load %arg4[%c0_3, %c0_4, %c0_5] : memref<1x8x128xf32, #tpu.memory_space<vmem>>, vector<1x8x128xf32>
    %6 = vector.shape_cast %5 : vector<1x8x128xf32> to vector<8x128xf32>
    %cst = arith.constant dense<0.000000e+00> : vector<8x8xf32>
    %7 = tpu.matmul %4, %6, %cst {dimension_numbers = #tpu.dot_dimension_numbers<[1], [1], [0], [0], [0, 0, 1, 0], [], []>, precision = #tpu.contract_precision<fp32>} : vector<8x128xf32>, vector<8x128xf32>, vector<8x8xf32> -> vector<8x8xf32>
    %cst_6 = arith.constant 0.353553385 : f32
    %8 = vector.broadcast %cst_6 : f32 to vector<8x8xf32>
    %9 = arith.mulf %7, %8 : vector<8x8xf32>
    %c0_7 = arith.constant 0 : index
    %c0_8 = arith.constant 0 : index
    %10 = vector.load %arg7[%c0_7, %c0_8] : memref<8x1xf32, #tpu.memory_space<vmem>>, vector<8x1xf32>
    %cst_9 = arith.constant dense<0xFF800000> : vector<8xf32>
    %11 = vector.multi_reduction <maximumf>, %9, %cst_9 [1] : vector<8x8xf32> to vector<8xf32>
    %12 = vector.shape_cast %11 : vector<8xf32> to vector<8x1xf32>
    %13 = arith.maximumf %10, %12 : vector<8x1xf32>
    %14 = arith.subf %10, %13 : vector<8x1xf32>
    %15 = math.exp %14 : vector<8x1xf32>
    %16 = vector.broadcast %13 : vector<8x1xf32> to vector<8x8xf32>
    %17 = arith.subf %9, %16 : vector<8x8xf32>
    %18 = math.exp %17 : vector<8x8xf32>
    %c0_10 = arith.constant 0 : index
    %c0_11 = arith.constant 0 : index
    %19 = vector.load %arg8[%c0_10, %c0_11] : memref<8x1xf32, #tpu.memory_space<vmem>>, vector<8x1xf32>
    %20 = arith.mulf %15, %19 : vector<8x1xf32>
    %cst_12 = arith.constant dense<0.000000e+00> : vector<8xf32>
    %21 = vector.multi_reduction <add>, %18, %cst_12 [1] : vector<8x8xf32> to vector<8xf32>
    %22 = vector.shape_cast %21 : vector<8xf32> to vector<8x1xf32>
    %23 = arith.addf %20, %22 : vector<8x1xf32>
    %c0_13 = arith.constant 0 : index
    %c0_14 = arith.constant 0 : index
    %24 = vector.load %arg8[%c0_13, %c0_14] : memref<8x1xf32, #tpu.memory_space<vmem>>, vector<8x1xf32>
    tpu.vector_store %arg8[%c0_13, %c0_14], %23 {strides = array<i32>} : memref<8x1xf32, #tpu.memory_space<vmem>>, vector<8x1xf32>,
    %c0_15 = arith.constant 0 : index
    %c0_16 = arith.constant 0 : index
    %25 = vector.load %arg9[%c0_15, %c0_16] : memref<8x128xf32, #tpu.memory_space<vmem>>, vector<8x128xf32>
    %26 = vector.broadcast %15 : vector<8x1xf32> to vector<8x128xf32>
    %27 = arith.mulf %26, %25 : vector<8x128xf32>
    %c0_17 = arith.constant 0 : index
    %c0_18 = arith.constant 0 : index
    %c0_19 = arith.constant 0 : index
    %28 = vector.load %arg5[%c0_17, %c0_18, %c0_19] : memref<1x8x128xf32, #tpu.memory_space<vmem>>, vector<1x8x128xf32>
    %29 = vector.shape_cast %28 : vector<1x8x128xf32> to vector<8x128xf32>
    %cst_20 = arith.constant dense<0.000000e+00> : vector<8x128xf32>
    %30 = tpu.matmul %18, %29, %cst_20 {dimension_numbers = #tpu.dot_dimension_numbers<[1], [0], [0], [1], [0, 0, 1, 1], [], []>, precision = #tpu.contract_precision<fp32>} : vector<8x8xf32>, vector<8x128xf32>, vector<8x128xf32> -> vector<8x128xf32>
    %31 = arith.addf %27, %30 : vector<8x128xf32>
    %c0_21 = arith.constant 0 : index
    %c0_22 = arith.constant 0 : index
    %32 = vector.load %arg9[%c0_21, %c0_22] : memref<8x128xf32, #tpu.memory_space<vmem>>, vector<8x128xf32>
    tpu.vector_store %arg9[%c0_21, %c0_22], %31 {strides = array<i32>} : memref<8x128xf32, #tpu.memory_space<vmem>>, vector<8x128xf32>,
    %c0_23 = arith.constant 0 : index
    %c0_24 = arith.constant 0 : index
    %33 = vector.load %arg7[%c0_23, %c0_24] : memref<8x1xf32, #tpu.memory_space<vmem>>, vector<8x1xf32>
    tpu.vector_store %arg7[%c0_23, %c0_24], %13 {strides = array<i32>} : memref<8x1xf32, #tpu.memory_space<vmem>>, vector<8x1xf32>,
    %c0_i32_25 = arith.constant 0 : i32
    %34 = arith.cmpi eq, %arg2, %c0_i32_25 : i32
    %35 = arith.extui %34 : i1 to i32
    %c0_i32_26 = arith.constant 0 : i32
    %36 = arith.cmpi ne, %35, %c0_i32_26 : i32
    scf.if %36 {
      %c0_27 = arith.constant 0 : index
      %c0_28 = arith.constant 0 : index
      %37 = vector.load %arg9[%c0_27, %c0_28] : memref<8x128xf32, #tpu.memory_space<vmem>>, vector<8x128xf32>
      %c0_29 = arith.constant 0 : index
      %c0_30 = arith.constant 0 : index
      %38 = vector.load %arg8[%c0_29, %c0_30] : memref<8x1xf32, #tpu.memory_space<vmem>>, vector<8x1xf32>
      %39 = vector.broadcast %38 : vector<8x1xf32> to vector<8x128xf32>
      %40 = arith.divf %37, %39 : vector<8x128xf32>
      %c0_31 = arith.constant 0 : index
      %c0_32 = arith.constant 0 : index
      %c0_33 = arith.constant 0 : index
      %41 = vector.load %arg6[%c0_31, %c0_32, %c0_33] : memref<1x8x128xf32, #tpu.memory_space<vmem>>, vector<1x8x128xf32>
      %42 = vector.shape_cast %41 : vector<1x8x128xf32> to vector<8x128xf32>
      %43 = vector.shape_cast %40 : vector<8x128xf32> to vector<1x8x128xf32>
      tpu.vector_store %arg6[%c0_31, %c0_32, %c0_33], %43 {strides = array<i32>} : memref<1x8x128xf32, #tpu.memory_space<vmem>>, vector<1x8x128xf32>,
    } else {
    }
    return
  }
  func.func @transform_0(%arg0: i32, %arg1: i32, %arg2: i32) -> (i32, i32, i32) {
    %c0_i32 = arith.constant 0 : i32
    %c0_i32_0 = arith.constant 0 : i32
    return %arg0, %arg1, %c0_i32 : i32, i32, i32
  }
  func.func @transform_1(%arg0: i32, %arg1: i32, %arg2: i32) -> (i32, i32, i32) {
    %c0_i32 = arith.constant 0 : i32
    %c0_i32_0 = arith.constant 0 : i32
    return %arg0, %arg2, %c0_i32 : i32, i32, i32
  }
  func.func @transform_2(%arg0: i32, %arg1: i32, %arg2: i32) -> (i32, i32, i32) {
    %c0_i32 = arith.constant 0 : i32
    %c0_i32_0 = arith.constant 0 : i32
    return %arg0, %arg2, %c0_i32 : i32, i32, i32
  }
  func.func @transform_3(%arg0: i32, %arg1: i32, %arg2: i32) -> (i32, i32, i32) {
    %c0_i32 = arith.constant 0 : i32
    %c0_i32_0 = arith.constant 0 : i32
    return %arg0, %arg1, %c0_i32 : i32, i32, i32
  }
}

</mosaic_0001>

<bundles_post_ra>
// kernel: acausal_self_attention.3
= control target key start
LH: loop header
LB: loop body
LE: loop exit
PB: predicated region body
PF: predicated region fallthrough
CT: control target
= control target key end

     0   :  { %s1500_s1 = inlined_call_operand.vmem [shape: f32[128,128], index: 1, kind: input, shape index: {}]   ;;  %s1501_s0 = inlined_call_operand.vmem [shape: f32[16,128], index: 0, kind: input, shape index: {}]   ;;  %s1502_s2 = inlined_call_operand.vmem [shape: f32[1,128], index: 2, kind: input, shape index: {}]   ;;  %s1503_s3 = inlined_call_operand.vmem [shape: f32[16,128], index: 3, kind: output, shape index: {}]  }
   0x1   :  { %v39_v0 = vld [vmem:[%s1500_s1 + $0x78] sm:$0xff]  ;;  %v38_v1 = vld [vmem:[%s1500_s1 + $0x70] sm:$0xff]  ;;  %v37_v2 = vld [vmem:[%s1500_s1 + $0x68] sm:$0xff] }
   0x2   :  { %v1096_v3 = vand.u32 4294901760, %v39_v0  ;;  %v1098_v4 = vand.u32 4294901760, %v38_v1  ;;  %v1100_v5 = vand.u32 4294901760, %v37_v2  ;;  %v36_v6 = vld [vmem:[%s1500_s1 + $0x60] sm:$0xff]  ;;  %v35_v7 = vld [vmem:[%s1500_s1 + $0x58] sm:$0xff]  ;;  %v34_v8 = vld [vmem:[%s1500_s1 + $0x50] sm:$0xff] }
   0x3   :  { %v1111_v9 = vand.u32 4294901760, %v36_v6  ;;  %v1113_v10 = vand.u32 4294901760, %v35_v7  ;;  %v1115_v11 = vand.u32 4294901760, %v34_v8  ;;  %v33_v12 = vld [vmem:[%s1500_s1 + $0x48] sm:$0xff]  ;;  %v32_v13 = vld [vmem:[%s1500_s1 + $0x40] sm:$0xff]  ;;  %v31_v18 = vld [vmem:[%s1500_s1 + $0x38] sm:$0xff] }
   0x4   :  { %857 = vmatprep.subr.mxu0 %v1096_v3  ;;  %v1125_v14 = vsub.f32 %v39_v0, %v1096_v3  ;;  %v1128_v15 = vsub.f32 %v38_v1, %v1098_v4  ;;  %v1130_v16 = vand.u32 4294901760, %v33_v12  ;;  %v1133_v17 = vsub.f32 %v37_v2, %v1100_v5  ;;  %v30_v25 = vld [vmem:[%s1500_s1 + $0x30] sm:$0xff]  ;;  %v29_v35 = vld [vmem:[%s1500_s1 + $0x28] sm:$0xff]  ;;  %v28_v40 = vld [vmem:[%s1500_s1 + $0x20] sm:$0xff] }
   0x5   :  { %858 = vmatpush3.msra.mxu0 %v1096_v3  ;;  %v1140_v19 = vsub.f32 %v36_v6, %v1111_v9  ;;  %v1143_v20 = vsub.f32 %v35_v7, %v1113_v10  ;;  %v1155_v24 = vand.u32 4294901760, %v32_v13  ;;  %v1164_v27 = vand.u32 4294901760, %v31_v18  ;;  %v27_v48 = vld [vmem:[%s1500_s1 + $0x18] sm:$0xff]  ;;  %v22_v49 = vld [vmem:[%s1501_s0] sm:$0xff]  ;;  %v23_v54 = vld [vmem:[%s1501_s0 + $0x8] sm:$0xff] }
   0x6   :  { %859 = vmatprep.subr.mxu0 %v1098_v4  ;;  %v1147_v21 = vand.u32 4294901760, %v1125_v14  ;;  %v1150_v22 = vand.u32 4294901760, %v1128_v15  ;;  %v1153_v23 = vand.u32 4294901760, %v1133_v17  ;;  %v1170_v29 = vsub.f32 %v34_v8, %v1115_v11  ;;  %v26_v59 = vld [vmem:[%s1500_s1 + $0x10] sm:$0xff]  ;;  %v25_v2 = vld [vmem:[%s1500_s1 + $0x8] sm:$0xff] }
   0x7   :  { %860 = vmatpush3.msra.mxu0 %v1098_v4  ;;  %v1162_v26 = vand.u32 4294901760, %v1140_v19  ;;  %v1167_v28 = vand.u32 4294901760, %v1143_v20  ;;  %v1180_v33 = vsub.f32 %v33_v12, %v1130_v16  ;;  %v1183_v34 = vand.u32 4294901760, %v30_v25 }
   0x8   :  { %861 = vmatprep.subr.mxu0 %v1100_v5  ;;  %v145_v30 = vsub.f32 %v1125_v14, %v1147_v21  ;;  %v152_v31 = vsub.f32 %v1128_v15, %v1150_v22  ;;  %v159_v32 = vsub.f32 %v1133_v17, %v1153_v23  ;;  %v1192_v39 = vand.u32 4294901760, %v1170_v29 }
   0x9   :  { %862 = vmatpush3.msra.mxu0 %v1100_v5  ;;  %v166_v38 = vsub.f32 %v1140_v19, %v1162_v26  ;;  %v173_v41 = vsub.f32 %v1143_v20, %v1167_v28  ;;  %v1201_v42 = vand.u32 4294901760, %v1180_v33  ;;  %v1204_v43 = vsub.f32 %v32_v13, %v1155_v24 }
   0xa   :  { %863 = vmatprep.subr.mxu0 %v1111_v9  ;;  %v146_v36 = vand.u32 4294901760, %v145_v30  ;;  %v153_v37 = vand.u32 4294901760, %v152_v31  ;;  %v160_v44 = vand.u32 4294901760, %v159_v32  ;;  %v1207_v45 = vand.u32 4294901760, %v29_v35 }
   0xb   :  { %864 = vmatpush3.msra.mxu0 %v1111_v9  ;;  %v1210_v46 = vsub.f32 %v31_v18, %v1164_v27  ;;  %v1213_v47 = vand.u32 4294901760, %v28_v40  ;;  %v167_v50 = vand.u32 4294901760, %v166_v38  ;;  %v180_v51 = vsub.f32 %v1170_v29, %v1192_v39  ;;  %v24_v18 = vld [vmem:[%s1500_s1] sm:$0xff] }
   0xc   :  { %865 = vmatprep.subr.mxu0 %v1113_v10  ;;  %892 = vmatprep.subr.mxu1 %v146_v36  ;;  %v1225_v52 = vand.u32 4294901760, %v1204_v43  ;;  %v1228_v53 = vsub.f32 %v30_v25, %v1183_v34  ;;  %v174_v55 = vand.u32 4294901760, %v173_v41  ;;  %v187_v56 = vsub.f32 %v1180_v33, %v1201_v42 }
   0xd   :  { %866 = vmatpush3.msra.mxu0 %v1113_v10  ;;  %893 = vmatpush3.msra.mxu1 %v146_v36  ;;  %v1237_v57 = vand.u32 4294901760, %v27_v48  ;;  %v1240_v58 = vand.u32 4294901760, %v1210_v46  ;;  %v1246_v60 = vsub.f32 %v29_v35, %v1207_v45  ;;  %v1248_v61 = vand.u32 4294901760, %v22_v49 }
   0xe   :  { %867 = vmatprep.subr.mxu0 %v1115_v11  ;;  %894 = vmatprep.subr.mxu1 %v153_v37  ;;  %v1251_v62 = vand.u32 4294901760, %v23_v54  ;;  %v181_v63 = vand.u32 4294901760, %v180_v51  ;;  %v194_v0 = vsub.f32 %v1204_v43, %v1225_v52  ;;  %v1257_v1 = vand.u32 4294901760, %v1228_v53 }
   0xf   :  { %868 = vmatpush3.msra.mxu0 %v1115_v11  ;;  %895 = vmatpush3.msra.mxu1 %v153_v37  ;;  %v1263_v6 = vsub.f32 %v28_v40, %v1213_v47  ;;  %v188_v7 = vand.u32 4294901760, %v187_v56  ;;  %v1266_v8 = vand.u32 4294901760, %v26_v59  ;;  %v201_v12 = vsub.f32 %v1210_v46, %v1240_v58 }
  0x10   :  { %869 = vmatprep.subr.mxu0 %v1130_v16  ;;  %896 = vmatprep.subr.mxu1 %v160_v44  ;;  %v1272_v13 = vand.u32 4294901760, %v1246_v60  ;;  %v1278_v25 = vsub.f32 %v22_v49, %v1248_v61  ;;  %v1281_v30 = vsub.f32 %v27_v48, %v1237_v57  ;;  %v1284_v31 = vand.u32 4294901760, %v25_v2 }
  0x11   :  { %870 = vmatpush3.msra.mxu0 %v1130_v16  ;;  %897 = vmatpush3.msra.mxu1 %v160_v44  ;;  %v1287_v32 = vsub.f32 %v23_v54, %v1251_v62  ;;  %v195_v35 = vand.u32 4294901760, %v194_v0  ;;  %v208_v36 = vsub.f32 %v1228_v53, %v1257_v1  ;;  %v1293_v37 = vand.u32 4294901760, %v1263_v6 }
  0x12   :  { %871 = vmatprep.subr.mxu0 %v1155_v24  ;;  %898 = vmatprep.subr.mxu1 %v167_v50  ;;  %v1296_v38 = vand.u32 4294901760, %v24_v18  ;;  %v1299_v40 = vsub.f32 %v26_v59, %v1266_v8  ;;  %v202_v41 = vand.u32 4294901760, %v201_v12  ;;  %v215_v44 = vsub.f32 %v1246_v60, %v1272_v13 }
  0x13   :  { %872 = vmatpush3.msra.mxu0 %v1155_v24  ;;  %899 = vmatpush3.msra.mxu1 %v167_v50  ;;  %v1505_v48 = vand.u32 4294901760, %v1278_v25  ;;  %v1306_v49 = vand.u32 4294901760, %v1281_v30  ;;  %v1504_v50 = vand.u32 4294901760, %v1287_v32  ;;  %v1311_v51 = vsub.f32 %v25_v2, %v1284_v31 }
  0x14   :  { %873 = vmatprep.subr.mxu0 %v1164_v27  ;;  %900 = vmatprep.subr.mxu1 %v174_v55  ;;  %v209_v54 = vand.u32 4294901760, %v208_v36  ;;  %v1318_v56 = vand.u32 4294901760, %v1299_v40  ;;  %v1321_v59 = vsub.f32 %v24_v18, %v1296_v38 }
  0x15   :  { %874 = vmatpush3.msra.mxu0 %v1164_v27  ;;  %901 = vmatpush3.msra.mxu1 %v174_v55  ;;  %v222_v55 = vsub.f32 %v1263_v6, %v1293_v37  ;;  %v124_v0 = vsub.f32 %v1278_v25, %v1505_v48  ;;  %v229_v2 = vsub.f32 %v1281_v30, %v1306_v49  ;;  %v1334_v12 = vand.u32 4294901760, %v1311_v51 }
  0x16   :  { %875 = vmatprep.subr.mxu0 %v1183_v34  ;;  %902 = vmatprep.subr.mxu1 %v181_v63  ;;  %v1341_v36 = vand.u32 4294901760, %v1321_v59 }
  0x17   :  { %876 = vmatpush3.msra.mxu0 %v1183_v34  ;;  %903 = vmatpush3.msra.mxu1 %v181_v63  ;;  %v216_v63 = vand.u32 4294901760, %v215_v44  ;;  %v223_v18 = vand.u32 4294901760, %v222_v55  ;;  %v230_v44 = vand.u32 4294901760, %v229_v2  ;;  %v243_v55 = vsub.f32 %v1311_v51, %v1334_v12 }
  0x18   :  { %877 = vmatprep.subr.mxu0 %v1207_v45  ;;  %904 = vmatprep.subr.mxu1 %v188_v7  ;;  %v250_v48 = vsub.f32 %v1321_v59, %v1341_v36 }
  0x19   :  { %878 = vmatpush3.msra.mxu0 %v1207_v45  ;;  %905 = vmatpush3.msra.mxu1 %v188_v7  ;;  %v134_v7 = vsub.f32 %v1287_v32, %v1504_v50 }
  0x1a   :  { %879 = vmatprep.subr.mxu0 %v1213_v47  ;;  %906 = vmatprep.subr.mxu1 %v195_v35 }
  0x1b   :  { %880 = vmatpush3.msra.mxu0 %v1213_v47  ;;  %907 = vmatpush3.msra.mxu1 %v195_v35  ;;  %v236_v35 = vsub.f32 %v1299_v40, %v1318_v56  ;;  %v135_v50 = vand.u32 4294901760, %v134_v7 }
  0x1c   :  { %881 = vmatprep.subr.mxu0 %v1237_v57  ;;  %908 = vmatprep.subr.mxu1 %v202_v41 }
  0x1d   :  { %882 = vmatpush3.msra.mxu0 %v1237_v57  ;;  %909 = vmatpush3.msra.mxu1 %v202_v41  ;;  %v125_v41 = vand.u32 4294901760, %v124_v0  ;;  %v251_v0 = vand.u32 4294901760, %v250_v48 }
  0x1e   :  { %883 = vmatprep.subr.mxu0 %v1266_v8  ;;  %910 = vmatprep.subr.mxu1 %v209_v54 }
  0x1f   :  { %884 = vmatpush3.msra.mxu0 %v1266_v8  ;;  %911 = vmatpush3.msra.mxu1 %v209_v54  ;;  %v237_v54 = vand.u32 4294901760, %v236_v35 }
  0x20   :  { %885 = vmatprep.subr.mxu0 %v1284_v31  ;;  %912 = vmatprep.subr.mxu1 %v216_v63 }
  0x21   :  { %886 = vmatpush3.msra.mxu0 %v1284_v31  ;;  %913 = vmatpush3.msra.mxu1 %v216_v63  ;;  %v244_v63 = vand.u32 4294901760, %v243_v55 }
  0x22   :  { %887 = vmatprep.subr.mxu0 %v1296_v38  ;;  %914 = vmatprep.subr.mxu1 %v223_v18 }
  0x23   :  { %888 = vmatpush3.msra.mxu0 %v1296_v38  ;;  %915 = vmatpush3.msra.mxu1 %v223_v18 }
  0x24   :  { %889 = vmatprep.mubr.f32.mxu0 %v125_v41  ;;  %916 = vmatprep.subr.mxu1 %v230_v44 }
  0x25   :  { %927 = vmatprep.subr.mxu0 %v1125_v14  ;;  %890 = vmatmul.mubr.f32.vlgmr.msra.gmra.mxu0 %v135_v50 }
  0x26   :  { %917 = vmatpush3.msra.mxu1 %v230_v44  ;;  %928 = vmatpush3.msra.mxu0 %v1125_v14  ;;  %v1506_v14 = vand.u32 4294901760, %v1278_v25 }
  0x27   :  { %918 = vmatprep.subr.mxu1 %v237_v54  ;;  %929 = vmatprep.subr.mxu0 %v1128_v15 }
  0x28   :  { %919 = vmatpush3.msra.mxu1 %v237_v54  ;;  %930 = vmatpush3.msra.mxu0 %v1128_v15  ;;  %v1507_v15 = vand.u32 4294901760, %v1287_v32 }
  0x29   :  { %920 = vmatprep.subr.mxu1 %v244_v63  ;;  %931 = vmatprep.subr.mxu0 %v1133_v17 }
  0x2a   :  { %921 = vmatpush3.msra.mxu1 %v244_v63  ;;  %932 = vmatpush3.msra.mxu0 %v1133_v17 }
  0x2b   :  { %922 = vmatprep.subr.mxu1 %v251_v0  ;;  %933 = vmatprep.subr.mxu0 %v1140_v19 }
  0x2c   :  { %923 = vmatpush3.msra.mxu1 %v251_v0  ;;  %924 = vmatprep.mubr.f32.mxu1 %v1248_v61 }
  0x2d   :  { %934 = vmatpush3.msra.mxu0 %v1140_v19  ;;  %925 = vmatmul.mubr.f32.vlgmr.msra.gmra.mxu1 %v1251_v62 }
  0x2e   :  { %935 = vmatprep.subr.mxu0 %v1143_v20  ;;  %962 = vmatprep.subr.mxu1 %v1096_v3 }
  0x2f   :  { %936 = vmatpush3.msra.mxu0 %v1143_v20  ;;  %963 = vmatpush3.msra.mxu1 %v1096_v3 }
  0x30   :  { %937 = vmatprep.subr.mxu0 %v1170_v29  ;;  %964 = vmatprep.subr.mxu1 %v1098_v4 }
  0x31   :  { %938 = vmatpush3.msra.mxu0 %v1170_v29  ;;  %965 = vmatpush3.msra.mxu1 %v1098_v4 }
  0x32   :  { %939 = vmatprep.subr.mxu0 %v1180_v33  ;;  %966 = vmatprep.subr.mxu1 %v1100_v5 }
  0x33   :  { %940 = vmatpush3.msra.mxu0 %v1180_v33  ;;  %967 = vmatpush3.msra.mxu1 %v1100_v5  ;;  %v748_v33 = vld [vmem:[%s1502_s2] ss:$0 sm:$0xff] }
  0x34   :  { %941 = vmatprep.subr.mxu0 %v1204_v43  ;;  %968 = vmatprep.subr.mxu1 %v1111_v9 }
  0x35   :  { %942 = vmatpush3.msra.mxu0 %v1204_v43  ;;  %969 = vmatpush3.msra.mxu1 %v1111_v9 }
  0x36   :  { %943 = vmatprep.subr.mxu0 %v1210_v46  ;;  %970 = vmatprep.subr.mxu1 %v1113_v10 }
  0x37   :  { %944 = vmatpush3.msra.mxu0 %v1210_v46  ;;  %971 = vmatpush3.msra.mxu1 %v1113_v10 }
  0x38   :  { %945 = vmatprep.subr.mxu0 %v1228_v53  ;;  %972 = vmatprep.subr.mxu1 %v1115_v11 }
  0x39   :  { %946 = vmatpush3.msra.mxu0 %v1228_v53  ;;  %973 = vmatpush3.msra.mxu1 %v1115_v11 }
  0x3a   :  { %947 = vmatprep.subr.mxu0 %v1246_v60  ;;  %974 = vmatprep.subr.mxu1 %v1130_v16 }
  0x3b   :  { %948 = vmatpush3.msra.mxu0 %v1246_v60  ;;  %975 = vmatpush3.msra.mxu1 %v1130_v16 }
  0x3c   :  { %949 = vmatprep.subr.mxu0 %v1263_v6  ;;  %976 = vmatprep.subr.mxu1 %v1155_v24 }
  0x3d   :  { %950 = vmatpush3.msra.mxu0 %v1263_v6  ;;  %977 = vmatpush3.msra.mxu1 %v1155_v24 }
  0x3e   :  { %951 = vmatprep.subr.mxu0 %v1281_v30  ;;  %978 = vmatprep.subr.mxu1 %v1164_v27 }
  0x3f   :  { %952 = vmatpush3.msra.mxu0 %v1281_v30  ;;  %979 = vmatpush3.msra.mxu1 %v1164_v27 }
  0x40   :  { %953 = vmatprep.subr.mxu0 %v1299_v40  ;;  %980 = vmatprep.subr.mxu1 %v1183_v34 }
  0x41   :  { %954 = vmatpush3.msra.mxu0 %v1299_v40  ;;  %981 = vmatpush3.msra.mxu1 %v1183_v34 }
  0x42   :  { %955 = vmatprep.subr.mxu0 %v1311_v51  ;;  %982 = vmatprep.subr.mxu1 %v1207_v45 }
  0x43   :  { %956 = vmatpush3.msra.mxu0 %v1311_v51  ;;  %983 = vmatpush3.msra.mxu1 %v1207_v45 }
  0x44   :  { %957 = vmatprep.subr.mxu0 %v1321_v59  ;;  %984 = vmatprep.subr.mxu1 %v1213_v47 }
  0x45   :  { %958 = vmatpush3.msra.mxu0 %v1321_v59  ;;  %959 = vmatprep.mubr.f32.mxu0 %v1278_v25 }
  0x46   :  { %985 = vmatpush3.msra.mxu1 %v1213_v47  ;;  %960 = vmatmul.mubr.f32.vlgmr.msra.gmra.mxu0 %v1287_v32 }
  0x47   :  { %986 = vmatprep.subr.mxu1 %v1237_v57  ;;  %997 = vmatprep.subr.mxu0 %v1147_v21 }
  0x48   :  { %987 = vmatpush3.msra.mxu1 %v1237_v57  ;;  %998 = vmatpush3.msra.mxu0 %v1147_v21 }
  0x49   :  { %988 = vmatprep.subr.mxu1 %v1266_v8  ;;  %999 = vmatprep.subr.mxu0 %v1150_v22 }
  0x4a   :  { %989 = vmatpush3.msra.mxu1 %v1266_v8  ;;  %1000 = vmatpush3.msra.mxu0 %v1150_v22 }
  0x4b   :  { %990 = vmatprep.subr.mxu1 %v1284_v31  ;;  %1001 = vmatprep.subr.mxu0 %v1153_v23 }
  0x4c   :  { %991 = vmatpush3.msra.mxu1 %v1284_v31  ;;  %1002 = vmatpush3.msra.mxu0 %v1153_v23 }
  0x4d   :  { %992 = vmatprep.subr.mxu1 %v1296_v38  ;;  %1003 = vmatprep.subr.mxu0 %v1162_v26 }
  0x4e   :  { %993 = vmatpush3.msra.mxu1 %v1296_v38  ;;  %994 = vmatprep.mubr.f32.mxu1 %v1506_v14 }
  0x4f   :  { %1004 = vmatpush3.msra.mxu0 %v1162_v26  ;;  %995 = vmatmul.mubr.f32.vlgmr.msra.gmra.mxu1 %v1507_v15 }
  0x50   :  { %1005 = vmatprep.subr.mxu0 %v1167_v28  ;;  %1032 = vmatprep.subr.mxu1 %v1096_v3 }
  0x51   :  { %1006 = vmatpush3.msra.mxu0 %v1167_v28  ;;  %1033 = vmatpush3.msra.mxu1 %v1096_v3 }
  0x52   :  { %1007 = vmatprep.subr.mxu0 %v1192_v39  ;;  %1034 = vmatprep.subr.mxu1 %v1098_v4 }
  0x53   :  { %1008 = vmatpush3.msra.mxu0 %v1192_v39  ;;  %1035 = vmatpush3.msra.mxu1 %v1098_v4 }
  0x54   :  { %1009 = vmatprep.subr.mxu0 %v1201_v42  ;;  %1036 = vmatprep.subr.mxu1 %v1100_v5 }
  0x55   :  { %1010 = vmatpush3.msra.mxu0 %v1201_v42  ;;  %1037 = vmatpush3.msra.mxu1 %v1100_v5 }
  0x56   :  { %1011 = vmatprep.subr.mxu0 %v1225_v52  ;;  %1038 = vmatprep.subr.mxu1 %v1111_v9 }
  0x57   :  { %1012 = vmatpush3.msra.mxu0 %v1225_v52  ;;  %1039 = vmatpush3.msra.mxu1 %v1111_v9 }
  0x58   :  { %1013 = vmatprep.subr.mxu0 %v1240_v58  ;;  %1040 = vmatprep.subr.mxu1 %v1113_v10 }
  0x59   :  { %1014 = vmatpush3.msra.mxu0 %v1240_v58  ;;  %1041 = vmatpush3.msra.mxu1 %v1113_v10 }
  0x5a   :  { %1015 = vmatprep.subr.mxu0 %v1257_v1  ;;  %1042 = vmatprep.subr.mxu1 %v1115_v11 }
  0x5b   :  { %1016 = vmatpush3.msra.mxu0 %v1257_v1  ;;  %1043 = vmatpush3.msra.mxu1 %v1115_v11 }
  0x5c   :  { %1017 = vmatprep.subr.mxu0 %v1272_v13  ;;  %1044 = vmatprep.subr.mxu1 %v1130_v16 }
  0x5d   :  { %1018 = vmatpush3.msra.mxu0 %v1272_v13  ;;  %1045 = vmatpush3.msra.mxu1 %v1130_v16 }
  0x5e   :  { %1019 = vmatprep.subr.mxu0 %v1293_v37  ;;  %1046 = vmatprep.subr.mxu1 %v1155_v24 }
  0x5f   :  { %1020 = vmatpush3.msra.mxu0 %v1293_v37  ;;  %1047 = vmatpush3.msra.mxu1 %v1155_v24 }
  0x60   :  { %1021 = vmatprep.subr.mxu0 %v1306_v49  ;;  %1048 = vmatprep.subr.mxu1 %v1164_v27 }
  0x61   :  { %1022 = vmatpush3.msra.mxu0 %v1306_v49  ;;  %1049 = vmatpush3.msra.mxu1 %v1164_v27 }
  0x62   :  { %1023 = vmatprep.subr.mxu0 %v1318_v56  ;;  %1050 = vmatprep.subr.mxu1 %v1183_v34 }
  0x63   :  { %1024 = vmatpush3.msra.mxu0 %v1318_v56  ;;  %1051 = vmatpush3.msra.mxu1 %v1183_v34 }
  0x64   :  { %1025 = vmatprep.subr.mxu0 %v1334_v12  ;;  %1052 = vmatprep.subr.mxu1 %v1207_v45 }
  0x65   :  { %1026 = vmatpush3.msra.mxu0 %v1334_v12  ;;  %1053 = vmatpush3.msra.mxu1 %v1207_v45 }
  0x66   :  { %1027 = vmatprep.subr.mxu0 %v1341_v36  ;;  %1054 = vmatprep.subr.mxu1 %v1213_v47 }
  0x67   :  { %1028 = vmatpush3.msra.mxu0 %v1341_v36  ;;  %1029 = vmatprep.mubr.f32.mxu0 %v1248_v61 }
  0x68   :  { %1055 = vmatpush3.msra.mxu1 %v1213_v47  ;;  %1030 = vmatmul.mubr.f32.vlgmr.msra.gmra.mxu0 %v1251_v62 }
  0x69   :  { %1056 = vmatprep.subr.mxu1 %v1237_v57  ;;  %1064 = vmatprep.mubr.f32.mxu1 %v1248_v61 }
  0x6a   :  { %1057 = vmatpush3.msra.mxu1 %v1237_v57 }
  0x6b   :  { %1058 = vmatprep.subr.mxu1 %v1266_v8 }
  0x6c   :  { %1059 = vmatpush3.msra.mxu1 %v1266_v8 }
  0x6d   :  { %1060 = vmatprep.subr.mxu1 %v1284_v31 }
  0x6e   :  { %1061 = vmatpush3.msra.mxu1 %v1284_v31 }
  0x6f   :  { %1062 = vmatprep.subr.mxu1 %v1296_v38 }
  0x70   :  { %1063 = vmatpush3.msra.mxu1 %v1296_v38 }
  0x71   :  { %1065 = vmatmul.mubr.f32.vlgmr.msra.gmra.mxu1 %v1251_v62 }
  0xe5   :  { %v891_v3 = vpop.f32.mrf.mxu0 }
  0xe7   :  { %v127_v4 = vpop.f32.mrf.mxu0 }
  0xed   :  { %v926_v5 = vpop.f32.mrf.mxu1 }
  0xee   :  { %v295_v17 = vadd.f32 %v926_v5, %v891_v3 }
  0xef   :  { %v288_v10 = vpop.f32.mrf.mxu1 }
  0xf0   :  { %v289_v20 = vadd.f32 %v288_v10, %v127_v4 }
 0x106   :  { %v961_v9 = vpop.f32.mrf.mxu0 }
 0x107   :  { %v406_v21 = vadd.f32 %v961_v9, %v295_v17 }
 0x108   :  { %v398_v11 = vpop.f32.mrf.mxu0 }
 0x109   :  { %v399_v23 = vadd.f32 %v398_v11, %v289_v20 }
 0x10f   :  { %v996_v16 = vpop.f32.mrf.mxu1 }
 0x110   :  { %v503_v24 = vadd.f32 %v996_v16, %v406_v21 }
 0x111   :  { %v494_v22 = vpop.f32.mrf.mxu1 }
 0x112   :  { %v495_v27 = vadd.f32 %v494_v22, %v399_v23 }
 0x128   :  { %v1031_v19 = vpop.f32.mrf.mxu0 }
 0x129   :  { %v628_v28 = vadd.f32 %v1031_v19, %v503_v24 }
 0x12a   :  { %v621_v26 = vpop.f32.mrf.mxu0 }
 0x12b   :  { %v622_v34 = vadd.f32 %v621_v26, %v495_v27 }
 0x131   :  { %v1066_v29 = vpop.f32.mrf.mxu1 }
 0x132   :  { %v721_v39 = vadd.f32 %v1066_v29, %v628_v28 }
 0x133   :  { %v714_v42 = vpop.f32.mrf.mxu1 }
 0x134   :  { %v741_v43 = vadd.f32 %v748_v33, %v721_v39  ;;  %v715_v45 = vadd.f32 %v714_v42, %v622_v34 }
 0x136   :  { %743 = vst [vmem:[%s1503_s3 + $0x8] sm:$0xff] %v741_v43  ;;  %v740_v46 = vadd.f32 %v748_v33, %v715_v45 }
 0x138   :  { %742 = vst [vmem:[%s1503_s3] sm:$0xff] %v740_v46 }

// kernel: acausal_self_attention.4
= control target key start
LH: loop header
LB: loop body
LE: loop exit
PB: predicated region body
PF: predicated region fallthrough
CT: control target
= control target key end

     0   :  { %s1501_s12 = smov 0   ;;  %s1503_s13 = smov 0   ;;  %s1590_s0 = inlined_call_operand.vmem [shape: f32[8,8,128], index: 0, kind: input, shape index: {}]   ;;  %s1591_s1 = inlined_call_operand.vmem [shape: f32[8,8,128], index: 1, kind: input, shape index: {}]   ;;  %s1592_s2 = inlined_call_operand.vmem [shape: f32[8,8,128], index: 2, kind: input, shape index: {}]   ;;  %s1593_s3 = inlined_call_operand.vmem [shape: f32[8,8,128], index: 3, kind: output, shape index: {}]  }
   0x1   :  { %s1505_s14 = smov 0  }
   0x2 LB: > { %s32_s15 = sadd.s32 1, %s1471_s13  ;;  %p1326_p0 = scmp.ge.s32.totalorder %s1475_s14, 1  ;;  %s1475_s14 = sphi %s1505_s14, %s13_s14   ;;  %s1471_s13 = sphi %s1503_s13, %s1595_s13   ;;  %s1467_s12 = sphi %s1501_s12, %s1594_s12  }
   0x3   : > { %p34_p1 = scmp.ge.s32.totalorder %s32_s15, 8  ;;  %p190_p2 = scmp.lt.s32.totalorder %s1475_s14, 9 }
   0x5   : > { %s1597_s15 = smov (%p34_p1, %s32_s15), 0  ;;  %p191_p3 = pnand %p1326_p0, %p190_p2 }
   0x6   : > { %p232_p4 = scmp.lt.s32.totalorder (!%p191_p3), %s1467_s12, 7 }
   0x7   : > { %194 = sbr.rel (%p191_p3) target bundleno = 807 (0x327), region = 32 }
   0xc   : > { %v1477_v0 = vmov 0.0   ;;  %vm1478_vm0 = vmmov 0   ;;  %s1599_s12 = smov (!%p232_p4, %s1467_s12), 7  ;;  %vm264_vm1 = vcmask 7168   ;;  %v1479_v13 = vmov -1e+30  }
   0xd   : > { %1357 = vmatprep.subr.mxu0 %v1477_v0  ;;  %1359 = vmatprep.mubr.msk.f32.mxu0 %vm1478_vm0, %v1477_v0  ;;  %s1525_s16 = sshll.u32 %s1599_s12, 3  ;;  %265 = vst.msk [vmem:[#allocation2] sm:$0xff] %vm264_vm1, %v1479_v13  ;;  %266 = vst.msk [vmem:[#allocation3] sm:$0xff] %vm264_vm1, %v1477_v0  ;;  %vm718_vm2 = vcmask 64512   ;;  %v1480_v33 = vmov 0  }
   0xe   : > { %1362 = vmatprep.subr.mxu1 %v1477_v0  ;;  %1364 = vmatprep.mubr.msk.f32.mxu1 %vm1478_vm0, %v1477_v0  ;;  %s245_s19 = scalar_lea.vmem %s1591_s1, %s1525_s16  ;;  %s238_s22 = scalar_lea.vmem %s1590_s0, %s1525_s16 }
   0xf   : > { %v269_v1 = vld [vmem:[%s245_s19] sm:$0xff]  ;;  %1445 = vset.pattern.permute.xlu0 %v1480_v33  ;;  %1446 = vset.pattern.permute.xlu1 %v1480_v33  ;;  %s252_s25 = scalar_lea.vmem %s1592_s2, %s1525_s16  ;;  %s259_s28 = scalar_lea.vmem %s1593_s3, %s1525_s16 }
  0x10   : > { %v268_v2 = vld [vmem:[%s238_s22] sm:$0xff]  ;;  %v301_v3 = vand.u32 4294901760, %v269_v1 }
  0x11   : > { %v336_v4 = vand.u32 4294901760, %v268_v2  ;;  %v749_v38 = vld [vmem:[%s252_s25] sm:$0xff] }
  0x12   : > { %1358 = vmatpush3.xpose.msra.mxu0 %v301_v3  ;;  %v378_v6 = vsub.f32 %v269_v1, %v301_v3  ;;  %v784_v39 = vand.u32 4294901760, %v749_v38 }
  0x13   : > { %v337_v5 = vsub.f32 %v268_v2, %v336_v4  ;;  %1367 = vmatprep.subr.mxu0 %v1477_v0 }
  0x14   : > { %v379_v8 = vand.u32 4294901760, %v378_v6  ;;  %v717_v34 = vld [vmem:[#allocation2] sm:$0xff]  ;;  %v861_v40 = vsub.f32 %v749_v38, %v784_v39  ;;  %v734_v57 = vld [vmem:[#allocation3] sm:$0xff] }
  0x15   : > { %v338_v7 = vand.u32 4294901760, %v337_v5 }
  0x16   : > { %v380_v10 = vsub.f32 %v378_v6, %v379_v8  ;;  %v862_v41 = vand.u32 4294901760, %v861_v40 }
  0x17   : > { %v339_v9 = vsub.f32 %v337_v5, %v338_v7 }
  0x18   : > { %v381_v12 = vand.u32 4294901760, %v380_v10  ;;  %v863_v42 = vsub.f32 %v861_v40, %v862_v41 }
  0x19   : > { %v340_v11 = vand.u32 4294901760, %v339_v9 }
  0x1a   : > { %1363 = vmatpush3.xpose.msra.mxu1 %v381_v12  ;;  %v864_v43 = vand.u32 4294901760, %v863_v42 }
  0x1b   : > { %1360 = vmatmul.mubr.f32.vlgmr.msra.gmra.mxu0 %v340_v11  ;;  %1372 = vmatprep.subr.mxu1 %v1477_v0 }
  0x1c   : > { %1368 = vmatpush3.xpose.msra.mxu0 %v378_v6  ;;  %1369 = vmatprep.mubr.msk.f32.mxu0 %vm1478_vm0, %v1477_v0 }
  0x1d   : > { %1377 = vmatprep.subr.mxu0 %v1477_v0  ;;  %1365 = vmatmul.mubr.f32.vlgmr.msra.gmra.mxu1 %v336_v4 }
  0x1e   : > { %1373 = vmatpush3.xpose.msra.mxu1 %v301_v3  ;;  %1374 = vmatprep.mubr.msk.f32.mxu1 %vm1478_vm0, %v1477_v0 }
  0x1f   : > { %1370 = vmatmul.mubr.f32.vlgmr.msra.gmra.mxu0 %v337_v5  ;;  %1382 = vmatprep.subr.mxu1 %v1477_v0 }
  0x20   : > { %1378 = vmatpush3.xpose.msra.mxu0 %v379_v8  ;;  %1379 = vmatprep.mubr.msk.f32.mxu0 %vm1478_vm0, %v1477_v0 }
  0x21   : > { %1375 = vmatmul.mubr.f32.vlgmr.msra.gmra.mxu1 %v338_v7  ;;  %1387 = vmatprep.subr.mxu0 %v1477_v0 }
  0x22   : > { %1383 = vmatpush3.xpose.msra.mxu1 %v301_v3  ;;  %1384 = vmatprep.mubr.msk.f32.mxu1 %vm1478_vm0, %v1477_v0 }
  0x23   : > { %1380 = vmatmul.mubr.f32.vlgmr.msra.gmra.mxu0 %v336_v4  ;;  %1392 = vmatprep.subr.mxu1 %v1477_v0 }
  0x24   : > { %1389 = vmatprep.mubr.msk.f32.mxu0 %vm1478_vm0, %v1477_v0  ;;  %1388 = vmatpush3.msra.mxu0 %v784_v39 }
  0x25   : > { %1385 = vmatmul.mubr.f32.vlgmr.msra.gmra.mxu1 %v336_v4  ;;  %1397 = vmatprep.subr.mxu0 %v1477_v0 }
  0x26   : > { %1394 = vmatprep.mubr.msk.f32.mxu1 %vm1478_vm0, %v1477_v0  ;;  %1393 = vmatpush3.msra.mxu1 %v864_v43 }
  0x27   : > { %1402 = vmatprep.subr.mxu1 %v1477_v0 }
  0xdb   : > { %v342_v14 = vpop.f32.mrf.mxu0 }
  0xdd   : > { %v1361_v15 = vpop.f32.mrf.mxu0  ;;  %v418_v16 = vpop.f32.mrf.mxu1 }
  0xde   : > { %v419_v17 = vadd.f32 %v418_v16, %v342_v14 }
  0xdf   : > { %v492_v18 = vpop.f32.mrf.mxu0  ;;  %v1366_v19 = vpop.f32.mrf.mxu1 }
  0xe0   : > { %v493_v20 = vadd.f32 %v492_v18, %v419_v17 }
  0xe1   : > { %v1371_v21 = vpop.f32.mrf.mxu0  ;;  %v566_v22 = vpop.f32.mrf.mxu1 }
  0xe2   : > { %v567_v23 = vadd.f32 %v566_v22, %v493_v20 }
  0xe3   : > { %v640_v24 = vpop.f32.mrf.mxu0  ;;  %v1376_v25 = vpop.f32.mrf.mxu1 }
  0xe4   : > { %v641_v26 = vadd.f32 %v640_v24, %v567_v23 }
  0xe5   : > { %v1381_v27 = vpop.f32.mrf.mxu0  ;;  %v712_v28 = vpop.f32.mrf.mxu1 }
  0xe6   : > { %v713_v29 = vadd.f32 %v712_v28, %v641_v26 }
  0xe7   : > { %v1386_v30 = vpop.f32.mrf.mxu1 }
  0xe8   : > { %v716_v31 = vmul.f32 0.35355338, %v713_v29 }
  0xea   : > { %v719_v32 = vsel %vm718_vm2, %v716_v31, -inf }
  0xeb   : > { %720 = vmax.xlane.f32.xlu0 %v719_v32 }
 0x174   : > { %v721_v35 = vpop.xlane.xlu0 %720 }
 0x175   : > { %v722_v36 = vmax.f32 %v717_v34, %v721_v35 }
 0x177   : > { %v723_v37 = vsub.f32 %v717_v34, %v722_v36  ;;  %1201 = vst.msk [vmem:[#allocation2] sm:$0xff] %vm264_vm1, %v722_v36  ;;  %728 = vperm.xlu0 %1445, %v722_v36  }
 0x179   : > { %v724_v55 = vmul.f32 1.442695, %v723_v37 }
 0x1f2   : > { %v729_v44 = vpop.permute.xlu0 %728 }
 0x1f3   : > { %v731_v45 = vsub.f32 %v716_v31, %v729_v44 }
 0x1f5   : > { %v732_v46 = vmul.f32 1.442695, %v731_v45 }
 0x1f7   : > { %1447 = vpow2.f32 %v732_v46 }
 0x1f8   : > { %1449 = vpow2.f32 %v724_v55 }
 0x204   : > { %v1448_v47 = vpop.eup %1447 }
 0x205   : > { %v736_v48 = vsel %vm718_vm2, %v1448_v47, 0.0  ;;  %v751_v49 = vsel %vm718_vm2, %v1448_v47, 0  ;;  %v1450_v56 = vpop.eup %1449 }
 0x206   : > { %737 = vadd.xlane.f32.xlu1 %v736_v48  ;;  %v819_v50 = vand.u32 4294901760, %v751_v49  ;;  %v735_v58 = vmul.f32 %v1450_v56, %v734_v57 }
 0x208   : > { %v820_v51 = vsub.f32 %v751_v49, %v819_v50  ;;  %1395 = vmatmul.mubr.f32.vlgmr.msra.gmra.mxu1 %v819_v50 }
 0x209   : > { %1403 = vmatpush3.msra.mxu1 %v784_v39  ;;  %1404 = vmatprep.mubr.msk.f32.mxu1 %vm1478_vm0, %v1477_v0 }
 0x20a   : > { %v821_v52 = vand.u32 4294901760, %v820_v51  ;;  %1412 = vmatprep.subr.mxu1 %v1477_v0 }
 0x20c   : > { %1405 = vmatmul.mubr.f32.vlgmr.msra.gmra.mxu1 %v821_v52  ;;  %v822_v53 = vsub.f32 %v820_v51, %v821_v52 }
 0x20d   : > { %1413 = vmatpush3.msra.mxu1 %v784_v39  ;;  %1414 = vmatprep.mubr.msk.f32.mxu1 %vm1478_vm0, %v1477_v0 }
 0x20e   : > { %v823_v54 = vand.u32 4294901760, %v822_v53 }
 0x210   : > { %1390 = vmatmul.mubr.f32.vlgmr.msra.gmra.mxu0 %v823_v54  ;;  %1415 = vmatmul.mubr.f32.vlgmr.msra.gmra.mxu1 %v819_v50 }
 0x211   : > { %1398 = vmatpush3.msra.mxu0 %v861_v40  ;;  %1399 = vmatprep.mubr.msk.f32.mxu0 %vm1478_vm0, %v1477_v0 }
 0x212   : > { %1407 = vmatprep.subr.mxu0 %v1477_v0 }
 0x214   : > { %1400 = vmatmul.mubr.f32.vlgmr.msra.gmra.mxu0 %v820_v51 }
 0x215   : > { %1408 = vmatpush3.msra.mxu0 %v862_v41  ;;  %1409 = vmatprep.mubr.msk.f32.mxu0 %vm1478_vm0, %v1477_v0 }
 0x218   : > { %1410 = vmatmul.mubr.f32.vlgmr.msra.gmra.mxu0 %v819_v50 }
 0x28f   : > { %v738_v59 = vpop.xlane.xlu1 %737 }
 0x290   : > { %v739_v60 = vadd.f32 %v738_v59, %v735_v58 }
 0x292   : > { %741 = vst.msk [vmem:[#allocation3] sm:$0xff] %vm264_vm1, %v739_v60 }
 0x299   : > { %v1206_v61 = vld [vmem:[#allocation3] sm:$0xff] }
 0x29a   : > { %1209 = vperm.xlu1 %1446, %v1206_v61  }
 0x29e   : > { %745 = vperm.xlu1 %1446, %v1450_v56  }
 0x2c8   : > { %v901_v62 = vpop.f32.mrf.mxu1 }
 0x2ca   : > { %v1396_v63 = vpop.f32.mrf.mxu1 }
 0x2cc   : > { %v1049_v1 = vpop.f32.mrf.mxu1 }
 0x2ce   : > { %v1406_v2 = vpop.f32.mrf.mxu1 }
 0x2d0   : > { %v825_v3 = vpop.f32.mrf.mxu0  ;;  %v1195_v4 = vpop.f32.mrf.mxu1 }
 0x2d1   : > { %v902_v0 = vadd.f32 %v901_v62, %v825_v3 }
 0x2d2   : > { %v1391_v5 = vpop.f32.mrf.mxu0  ;;  %v1416_v6 = vpop.f32.mrf.mxu1 }
 0x2d4   : > { %v975_v7 = vpop.f32.mrf.mxu0 }
 0x2d5   : > { %v976_v8 = vadd.f32 %v975_v7, %v902_v0 }
 0x2d6   : > { %v1401_v9 = vpop.f32.mrf.mxu0 }
 0x2d7   : > { %v1050_v10 = vadd.f32 %v1049_v1, %v976_v8 }
 0x2d8   : > { %v1123_v11 = vpop.f32.mrf.mxu0 }
 0x2d9   : > { %v1124_v12 = vadd.f32 %v1123_v11, %v1050_v10 }
 0x2da   : > { %v1411_v13 = vpop.f32.mrf.mxu0 }
 0x2db   : > { %v1196_v14 = vadd.f32 %v1195_v4, %v1124_v12 }
 0x315   : > { %v1210_v15 = vpop.permute.xlu1 %1209 }
 0x316   : > { %1451 = vrcp.f32 %v1210_v15 }
 0x319   : > { %v746_v16 = vpop.permute.xlu1 %745 }
 0x31a   : > { %v748_v17 = vmul.f32 0.0, %v746_v16 }
 0x31c   : > { %v1199_v18 = vadd.f32 %v1196_v14, %v748_v17 }
 0x323   : > { %v1452_v19 = vpop.eup %1451 }
 0x324   : > { %v1213_v20 = vmul.f32 %v1452_v19, %v1199_v18 }
 0x326   : > { %1214 = vst [vmem:[%s259_s28] sm:$0xff] %v1213_v20 }
 0x327 PF: > { %s13_s14 = sadd.s32 1, %s1475_s14   ;;  %s1594_s12 = smov %s1471_s13 }
 0x328   : > { %p10_p5 = scmp.ge.s32.totalorder %s13_s14, 10   ;;  %s1595_s13 = smov %s1597_s15 }
 0x32a   :  { %12 = sbr.rel (!%p10_p5) target bundleno = 2 (0x2), region = 76 }

</bundles_post_ra>
